<compile_context>
chip_gen: v7x
topology: tpu7x:2x2x1
jax: 0.10.0
libtpu: 0.0.40
codegen_flags: <defaults>
</compile_context>

<pallas_src>
import jax
import jax.numpy as jnp
from jax.experimental import pallas as pl
from jax.experimental.pallas import tpu as pltpu

_LANES = 128
_GRANULE = 1024  # 8 sublanes * 128 lanes: minimum dense tile in lanes


def _evidential_kernel(w_ref, b_ref, x_ref, prob_ref, u_ref, alpha_ref):
    # w_ref:     SMEM (K, C_in)        1x1-conv weight (scalar reads)
    # b_ref:     SMEM (K,)             bias
    # x_ref:     VMEM (C_in, R, 128)   spatial tile, fully dense (R multiple of 8)
    # prob_ref:  VMEM (K, R, 128)
    # u_ref:     VMEM (1, R, 128)
    # alpha_ref: VMEM (K, R, 128)
    K, C_in = w_ref.shape

    # Load each channel once as a dense (R, 128) slab; compute in f32.
    xs = [x_ref[c].astype(jnp.float32) for c in range(C_in)]

    alphas = []
    S = None
    for k in range(K):
        # logits_k = b[k] + sum_c w[k, c] * x[c]  -- unrolled VPU MACs (C_in, K are tiny).
        # TODO(synk): switch to an MXU dot on a channel-minor view if C_in ever >= ~32.
        logit = None
        for c in range(C_in):
            term = xs[c] * w_ref[k, c]
            logit = term if logit is None else logit + term
        logit = logit + b_ref[k]
        # Numerically stable softplus(x) = max(x, 0) + log1p(exp(-|x|))  (matches F.softplus).
        evidence = jnp.maximum(logit, 0.0) + jnp.log1p(jnp.exp(-jnp.abs(logit)))
        alpha_k = evidence + 1.0
        alphas.append(alpha_k)
        S = alpha_k if S is None else S + alpha_k  # explicit VPU adds over K planes

    inv_S = 1.0 / S  # exact divide: prob planes sum to 1 exactly (f32)
    for k in range(K):
        alpha_ref[k] = alphas[k].astype(alpha_ref.dtype)
        prob_ref[k] = (alphas[k] * inv_S).astype(prob_ref.dtype)
    u_ref[0] = (float(K) * inv_S).astype(u_ref.dtype)


def evidential_head(x_nchw, weight, bias, *, max_tile_hw=32768):
    """x_nchw: (N, C_in, H, W); weight: (num_classes, C_in) [1x1 conv, squeezed]; bias: (num_classes,)."""
    N, C_in, H, W = x_nchw.shape
    K = weight.shape[0]
    HW = H * W

    # ---- Pad HW to a multiple of 1024 lanes (pure zero-pad; sliced off below). ------------
    HW_pad = ((HW + _GRANULE - 1) // _GRANULE) * _GRANULE
    x_r = x_nchw.reshape(N, C_in, HW)  # pure view, no transpose
    if HW_pad != HW:
        x_r = jnp.pad(x_r, ((0, 0), (0, 0), (0, HW_pad - HW)))

    # ---- Tile selection: largest divisor of HW_pad that is a multiple of 1024, ------------
    # ---- capped by max_tile_hw and a conservative VMEM budget (double-buffered). ----------
    m = HW_pad // _GRANULE
    bytes_per_lane_dbuf = 2 * (C_in + 2 * K + 1) * 4  # in + 3 outs, f32, double-buffered
    vmem_budget = 12 * 1024 * 1024
    cap_lanes = min(
        max_tile_hw,
        HW_pad,
        max(_GRANULE, (vmem_budget // bytes_per_lane_dbuf) // _GRANULE * _GRANULE),
    )
    cap_d = max(1, cap_lanes // _GRANULE)
    # v7x megacore: prefer >= 2 grid steps when batch alone cannot provide them.
    if N < 2 and m >= 2:
        cap_d = max(1, min(cap_d, m // 2))
    d = 1
    for cand in range(min(cap_d, m), 0, -1):
        if m % cand == 0:
            d = cand
            break
    tile_hw = d * _GRANULE
    tile_rows = tile_hw // _LANES
    rows_pad = HW_pad // _LANES

    # ---- 4-D dense view: (N, C, rows, 128); still a pure reshape. -------------------------
    x4 = x_r.reshape(N, C_in, rows_pad, _LANES)
    grid = (N, rows_pad // tile_rows)

    smem_spec = pl.BlockSpec(memory_space=pltpu.MemorySpace.SMEM)
    out_dtype = x_nchw.dtype

    prob, u, alpha = pl.pallas_call(
        _evidential_kernel,
        out_shape=(
            jax.ShapeDtypeStruct((N, K, rows_pad, _LANES), out_dtype),
            jax.ShapeDtypeStruct((N, 1, rows_pad, _LANES), out_dtype),
            jax.ShapeDtypeStruct((N, K, rows_pad, _LANES), out_dtype),
        ),
        grid=grid,
        in_specs=[
            smem_spec,                                                          # weight (K, C_in)
            smem_spec,                                                          # bias   (K,)
            pl.BlockSpec((None, C_in, tile_rows, _LANES), lambda b, j: (b, 0, j, 0)),
        ],
        out_specs=(
            pl.BlockSpec((None, K, tile_rows, _LANES), lambda b, j: (b, 0, j, 0)),
            pl.BlockSpec((None, 1, tile_rows, _LANES), lambda b, j: (b, 0, j, 0)),
            pl.BlockSpec((None, K, tile_rows, _LANES), lambda b, j: (b, 0, j, 0)),
        ),
        compiler_params=pltpu.CompilerParams(
            dimension_semantics=("parallel", "parallel"),
            vmem_limit_bytes=32 * 1024 * 1024,  # explicit headroom (v5e scoped default is 16 MiB)
        ),
    )(weight, bias, x4)

    # (N, K, HW_pad) is already NCHW-ordered; slice off padding and reshape (no transposes).
    prob = prob.reshape(N, K, HW_pad)[:, :, :HW].reshape(N, K, H, W)
    u = u.reshape(N, 1, HW_pad)[:, :, :HW].reshape(N, 1, H, W)
    alpha = alpha.reshape(N, K, HW_pad)[:, :, :HW].reshape(N, K, H, W)
    return prob, u, alpha


if __name__ == "__main__":
    # Small, deterministic example: batch=2, in_channels=4, spatial=16x16, num_classes=3
    N, C_in, H, W = 2, 4, 16, 16
    num_classes = 3

    key = jax.random.PRNGKey(0)
    kx, kw, kb = jax.random.split(key, 3)

    x = jax.random.normal(kx, (N, C_in, H, W), dtype=jnp.float32)
    # Deterministic param init (uniform, like PyTorch conv default bound 1/sqrt(fan_in))
    bound = 1.0 / (C_in ** 0.5)
    weight = jax.random.uniform(kw, (num_classes, C_in), jnp.float32, -bound, bound)
    bias = jax.random.uniform(kb, (num_classes,), jnp.float32, -bound, bound)

    prob, u, alpha = evidential_head(x, weight, bias)
    jax.block_until_ready((prob, u, alpha))

    # Lightweight sanity check against pure-JAX reference
    logits_ref = jnp.einsum("nchw,kc->nkhw", x, weight) + bias[None, :, None, None]
    evidence_ref = jax.nn.softplus(logits_ref)
    alpha_ref = evidence_ref + 1.0
    S_ref = alpha_ref.sum(1, keepdims=True)
    prob_ref = alpha_ref / S_ref
    u_ref = num_classes / S_ref
    assert jnp.allclose(prob, prob_ref, atol=1e-5)
    assert jnp.allclose(u, u_ref, atol=1e-5)
    assert jnp.allclose(alpha, alpha_ref, atol=1e-5)

    print("KERNEL_OK")
</pallas_src>

<mosaic_0001>
module attributes {stable_mosaic.version = 11 : i64} {
  func.func @_evidential_kernel(%arg0: i32, %arg1: i32, %arg2: memref<3x4xf32, #tpu.memory_space<smem>>, %arg3: memref<3xf32, #tpu.memory_space<smem>>, %arg4: memref<1x4x8x128xf32, #tpu.memory_space<vmem>>, %arg5: memref<1x3x8x128xf32, #tpu.memory_space<vmem>>, %arg6: memref<1x1x8x128xf32, #tpu.memory_space<vmem>>, %arg7: memref<1x3x8x128xf32, #tpu.memory_space<vmem>>) attributes {dimension_semantics = [#tpu.dimension_semantics<parallel>, #tpu.dimension_semantics<parallel>], iteration_bounds = array<i64: 2, 1>, scalar_prefetch = 0 : i64, scratch_operands = 0 : i64, tpu.core_type = #tpu.core_type<tc>, window_params = [{transform_indices = @transform_0, window_bounds = array<i64: 3, 4>}, {transform_indices = @transform_1, window_bounds = array<i64: 3>}, {transform_indices = @transform_2, window_bounds = array<i64: 1, 4, 8, 128>}, {transform_indices = @transform_3, window_bounds = array<i64: 1, 3, 8, 128>}, {transform_indices = @transform_4, window_bounds = array<i64: 1, 1, 8, 128>}, {transform_indices = @transform_5, window_bounds = array<i64: 1, 3, 8, 128>}]} {
    %c0 = arith.constant 0 : index
    %c0_0 = arith.constant 0 : index
    %c0_1 = arith.constant 0 : index
    %c0_2 = arith.constant 0 : index
    %0 = vector.load %arg4[%c0, %c0_0, %c0_1, %c0_2] : memref<1x4x8x128xf32, #tpu.memory_space<vmem>>, vector<1x1x8x128xf32>
    %1 = vector.shape_cast %0 : vector<1x1x8x128xf32> to vector<8x128xf32>
    %c0_3 = arith.constant 0 : index
    %c1 = arith.constant 1 : index
    %c0_4 = arith.constant 0 : index
    %c0_5 = arith.constant 0 : index
    %2 = vector.load %arg4[%c0_3, %c1, %c0_4, %c0_5] : memref<1x4x8x128xf32, #tpu.memory_space<vmem>>, vector<1x1x8x128xf32>
    %3 = vector.shape_cast %2 : vector<1x1x8x128xf32> to vector<8x128xf32>
    %c0_6 = arith.constant 0 : index
    %c2 = arith.constant 2 : index
    %c0_7 = arith.constant 0 : index
    %c0_8 = arith.constant 0 : index
    %4 = vector.load %arg4[%c0_6, %c2, %c0_7, %c0_8] : memref<1x4x8x128xf32, #tpu.memory_space<vmem>>, vector<1x1x8x128xf32>
    %5 = vector.shape_cast %4 : vector<1x1x8x128xf32> to vector<8x128xf32>
    %c0_9 = arith.constant 0 : index
    %c3 = arith.constant 3 : index
    %c0_10 = arith.constant 0 : index
    %c0_11 = arith.constant 0 : index
    %6 = vector.load %arg4[%c0_9, %c3, %c0_10, %c0_11] : memref<1x4x8x128xf32, #tpu.memory_space<vmem>>, vector<1x1x8x128xf32>
    %7 = vector.shape_cast %6 : vector<1x1x8x128xf32> to vector<8x128xf32>
    %c0_12 = arith.constant 0 : index
    %c0_13 = arith.constant 0 : index
    %8 = memref.load %arg2[%c0_12, %c0_13] : memref<3x4xf32, #tpu.memory_space<smem>>
    %9 = vector.broadcast %8 : f32 to vector<8x128xf32>
    %10 = arith.mulf %1, %9 : vector<8x128xf32>
    %c0_14 = arith.constant 0 : index
    %c1_15 = arith.constant 1 : index
    %11 = memref.load %arg2[%c0_14, %c1_15] : memref<3x4xf32, #tpu.memory_space<smem>>
    %12 = vector.broadcast %11 : f32 to vector<8x128xf32>
    %13 = arith.mulf %3, %12 : vector<8x128xf32>
    %14 = arith.addf %10, %13 : vector<8x128xf32>
    %c0_16 = arith.constant 0 : index
    %c2_17 = arith.constant 2 : index
    %15 = memref.load %arg2[%c0_16, %c2_17] : memref<3x4xf32, #tpu.memory_space<smem>>
    %16 = vector.broadcast %15 : f32 to vector<8x128xf32>
    %17 = arith.mulf %5, %16 : vector<8x128xf32>
    %18 = arith.addf %14, %17 : vector<8x128xf32>
    %c0_18 = arith.constant 0 : index
    %c3_19 = arith.constant 3 : index
    %19 = memref.load %arg2[%c0_18, %c3_19] : memref<3x4xf32, #tpu.memory_space<smem>>
    %20 = vector.broadcast %19 : f32 to vector<8x128xf32>
    %21 = arith.mulf %7, %20 : vector<8x128xf32>
    %22 = arith.addf %18, %21 : vector<8x128xf32>
    %c0_20 = arith.constant 0 : index
    %23 = memref.load %arg3[%c0_20] : memref<3xf32, #tpu.memory_space<smem>>
    %24 = vector.broadcast %23 : f32 to vector<8x128xf32>
    %25 = arith.addf %22, %24 : vector<8x128xf32>
    %cst = arith.constant 0.000000e+00 : f32
    %26 = vector.broadcast %cst : f32 to vector<8x128xf32>
    %27 = arith.maximumf %25, %26 : vector<8x128xf32>
    %28 = math.absf %25 : vector<8x128xf32>
    %cst_21 = arith.constant 0.000000e+00 : f32
    %29 = vector.broadcast %cst_21 : f32 to vector<8x128xf32>
    %30 = arith.subf %29, %28 : vector<8x128xf32>
    %31 = math.exp %30 : vector<8x128xf32>
    %32 = math.log1p %31 : vector<8x128xf32>
    %33 = arith.addf %27, %32 : vector<8x128xf32>
    %cst_22 = arith.constant 1.000000e+00 : f32
    %34 = vector.broadcast %cst_22 : f32 to vector<8x128xf32>
    %35 = arith.addf %33, %34 : vector<8x128xf32>
    %c1_23 = arith.constant 1 : index
    %c0_24 = arith.constant 0 : index
    %36 = memref.load %arg2[%c1_23, %c0_24] : memref<3x4xf32, #tpu.memory_space<smem>>
    %37 = vector.broadcast %36 : f32 to vector<8x128xf32>
    %38 = arith.mulf %1, %37 : vector<8x128xf32>
    %c1_25 = arith.constant 1 : index
    %c1_26 = arith.constant 1 : index
    %39 = memref.load %arg2[%c1_25, %c1_26] : memref<3x4xf32, #tpu.memory_space<smem>>
    %40 = vector.broadcast %39 : f32 to vector<8x128xf32>
    %41 = arith.mulf %3, %40 : vector<8x128xf32>
    %42 = arith.addf %38, %41 : vector<8x128xf32>
    %c1_27 = arith.constant 1 : index
    %c2_28 = arith.constant 2 : index
    %43 = memref.load %arg2[%c1_27, %c2_28] : memref<3x4xf32, #tpu.memory_space<smem>>
    %44 = vector.broadcast %43 : f32 to vector<8x128xf32>
    %45 = arith.mulf %5, %44 : vector<8x128xf32>
    %46 = arith.addf %42, %45 : vector<8x128xf32>
    %c1_29 = arith.constant 1 : index
    %c3_30 = arith.constant 3 : index
    %47 = memref.load %arg2[%c1_29, %c3_30] : memref<3x4xf32, #tpu.memory_space<smem>>
    %48 = vector.broadcast %47 : f32 to vector<8x128xf32>
    %49 = arith.mulf %7, %48 : vector<8x128xf32>
    %50 = arith.addf %46, %49 : vector<8x128xf32>
    %c1_31 = arith.constant 1 : index
    %51 = memref.load %arg3[%c1_31] : memref<3xf32, #tpu.memory_space<smem>>
    %52 = vector.broadcast %51 : f32 to vector<8x128xf32>
    %53 = arith.addf %50, %52 : vector<8x128xf32>
    %cst_32 = arith.constant 0.000000e+00 : f32
    %54 = vector.broadcast %cst_32 : f32 to vector<8x128xf32>
    %55 = arith.maximumf %53, %54 : vector<8x128xf32>
    %56 = math.absf %53 : vector<8x128xf32>
    %cst_33 = arith.constant 0.000000e+00 : f32
    %57 = vector.broadcast %cst_33 : f32 to vector<8x128xf32>
    %58 = arith.subf %57, %56 : vector<8x128xf32>
    %59 = math.exp %58 : vector<8x128xf32>
    %60 = math.log1p %59 : vector<8x128xf32>
    %61 = arith.addf %55, %60 : vector<8x128xf32>
    %cst_34 = arith.constant 1.000000e+00 : f32
    %62 = vector.broadcast %cst_34 : f32 to vector<8x128xf32>
    %63 = arith.addf %61, %62 : vector<8x128xf32>
    %64 = arith.addf %35, %63 : vector<8x128xf32>
    %c2_35 = arith.constant 2 : index
    %c0_36 = arith.constant 0 : index
    %65 = memref.load %arg2[%c2_35, %c0_36] : memref<3x4xf32, #tpu.memory_space<smem>>
    %66 = vector.broadcast %65 : f32 to vector<8x128xf32>
    %67 = arith.mulf %1, %66 : vector<8x128xf32>
    %c2_37 = arith.constant 2 : index
    %c1_38 = arith.constant 1 : index
    %68 = memref.load %arg2[%c2_37, %c1_38] : memref<3x4xf32, #tpu.memory_space<smem>>
    %69 = vector.broadcast %68 : f32 to vector<8x128xf32>
    %70 = arith.mulf %3, %69 : vector<8x128xf32>
    %71 = arith.addf %67, %70 : vector<8x128xf32>
    %c2_39 = arith.constant 2 : index
    %c2_40 = arith.constant 2 : index
    %72 = memref.load %arg2[%c2_39, %c2_40] : memref<3x4xf32, #tpu.memory_space<smem>>
    %73 = vector.broadcast %72 : f32 to vector<8x128xf32>
    %74 = arith.mulf %5, %73 : vector<8x128xf32>
    %75 = arith.addf %71, %74 : vector<8x128xf32>
    %c2_41 = arith.constant 2 : index
    %c3_42 = arith.constant 3 : index
    %76 = memref.load %arg2[%c2_41, %c3_42] : memref<3x4xf32, #tpu.memory_space<smem>>
    %77 = vector.broadcast %76 : f32 to vector<8x128xf32>
    %78 = arith.mulf %7, %77 : vector<8x128xf32>
    %79 = arith.addf %75, %78 : vector<8x128xf32>
    %c2_43 = arith.constant 2 : index
    %80 = memref.load %arg3[%c2_43] : memref<3xf32, #tpu.memory_space<smem>>
    %81 = vector.broadcast %80 : f32 to vector<8x128xf32>
    %82 = arith.addf %79, %81 : vector<8x128xf32>
    %cst_44 = arith.constant 0.000000e+00 : f32
    %83 = vector.broadcast %cst_44 : f32 to vector<8x128xf32>
    %84 = arith.maximumf %82, %83 : vector<8x128xf32>
    %85 = math.absf %82 : vector<8x128xf32>
    %cst_45 = arith.constant 0.000000e+00 : f32
    %86 = vector.broadcast %cst_45 : f32 to vector<8x128xf32>
    %87 = arith.subf %86, %85 : vector<8x128xf32>
    %88 = math.exp %87 : vector<8x128xf32>
    %89 = math.log1p %88 : vector<8x128xf32>
    %90 = arith.addf %84, %89 : vector<8x128xf32>
    %cst_46 = arith.constant 1.000000e+00 : f32
    %91 = vector.broadcast %cst_46 : f32 to vector<8x128xf32>
    %92 = arith.addf %90, %91 : vector<8x128xf32>
    %93 = arith.addf %64, %92 : vector<8x128xf32>
    %cst_47 = arith.constant 1.000000e+00 : f32
    %94 = vector.broadcast %cst_47 : f32 to vector<8x128xf32>
    %95 = arith.divf %94, %93 : vector<8x128xf32>
    %c0_48 = arith.constant 0 : index
    %c0_49 = arith.constant 0 : index
    %c0_50 = arith.constant 0 : index
    %c0_51 = arith.constant 0 : index
    %96 = vector.load %arg7[%c0_48, %c0_49, %c0_50, %c0_51] : memref<1x3x8x128xf32, #tpu.memory_space<vmem>>, vector<1x1x8x128xf32>
    %97 = vector.shape_cast %96 : vector<1x1x8x128xf32> to vector<8x128xf32>
    %98 = vector.shape_cast %35 : vector<8x128xf32> to vector<1x1x8x128xf32>
    tpu.vector_store %arg7[%c0_48, %c0_49, %c0_50, %c0_51], %98 {strides = array<i32>} : memref<1x3x8x128xf32, #tpu.memory_space<vmem>>, vector<1x1x8x128xf32>,
    %99 = arith.mulf %35, %95 : vector<8x128xf32>
    %c0_52 = arith.constant 0 : index
    %c0_53 = arith.constant 0 : index
    %c0_54 = arith.constant 0 : index
    %c0_55 = arith.constant 0 : index
    %100 = vector.load %arg5[%c0_52, %c0_53, %c0_54, %c0_55] : memref<1x3x8x128xf32, #tpu.memory_space<vmem>>, vector<1x1x8x128xf32>
    %101 = vector.shape_cast %100 : vector<1x1x8x128xf32> to vector<8x128xf32>
    %102 = vector.shape_cast %99 : vector<8x128xf32> to vector<1x1x8x128xf32>
    tpu.vector_store %arg5[%c0_52, %c0_53, %c0_54, %c0_55], %102 {strides = array<i32>} : memref<1x3x8x128xf32, #tpu.memory_space<vmem>>, vector<1x1x8x128xf32>,
    %c0_56 = arith.constant 0 : index
    %c1_57 = arith.constant 1 : index
    %c0_58 = arith.constant 0 : index
    %c0_59 = arith.constant 0 : index
    %103 = vector.load %arg7[%c0_56, %c1_57, %c0_58, %c0_59] : memref<1x3x8x128xf32, #tpu.memory_space<vmem>>, vector<1x1x8x128xf32>
    %104 = vector.shape_cast %103 : vector<1x1x8x128xf32> to vector<8x128xf32>
    %105 = vector.shape_cast %63 : vector<8x128xf32> to vector<1x1x8x128xf32>
    tpu.vector_store %arg7[%c0_56, %c1_57, %c0_58, %c0_59], %105 {strides = array<i32>} : memref<1x3x8x128xf32, #tpu.memory_space<vmem>>, vector<1x1x8x128xf32>,
    %106 = arith.mulf %63, %95 : vector<8x128xf32>
    %c0_60 = arith.constant 0 : index
    %c1_61 = arith.constant 1 : index
    %c0_62 = arith.constant 0 : index
    %c0_63 = arith.constant 0 : index
    %107 = vector.load %arg5[%c0_60, %c1_61, %c0_62, %c0_63] : memref<1x3x8x128xf32, #tpu.memory_space<vmem>>, vector<1x1x8x128xf32>
    %108 = vector.shape_cast %107 : vector<1x1x8x128xf32> to vector<8x128xf32>
    %109 = vector.shape_cast %106 : vector<8x128xf32> to vector<1x1x8x128xf32>
    tpu.vector_store %arg5[%c0_60, %c1_61, %c0_62, %c0_63], %109 {strides = array<i32>} : memref<1x3x8x128xf32, #tpu.memory_space<vmem>>, vector<1x1x8x128xf32>,
    %c0_64 = arith.constant 0 : index
    %c2_65 = arith.constant 2 : index
    %c0_66 = arith.constant 0 : index
    %c0_67 = arith.constant 0 : index
    %110 = vector.load %arg7[%c0_64, %c2_65, %c0_66, %c0_67] : memref<1x3x8x128xf32, #tpu.memory_space<vmem>>, vector<1x1x8x128xf32>
    %111 = vector.shape_cast %110 : vector<1x1x8x128xf32> to vector<8x128xf32>
    %112 = vector.shape_cast %92 : vector<8x128xf32> to vector<1x1x8x128xf32>
    tpu.vector_store %arg7[%c0_64, %c2_65, %c0_66, %c0_67], %112 {strides = array<i32>} : memref<1x3x8x128xf32, #tpu.memory_space<vmem>>, vector<1x1x8x128xf32>,
    %113 = arith.mulf %92, %95 : vector<8x128xf32>
    %c0_68 = arith.constant 0 : index
    %c2_69 = arith.constant 2 : index
    %c0_70 = arith.constant 0 : index
    %c0_71 = arith.constant 0 : index
    %114 = vector.load %arg5[%c0_68, %c2_69, %c0_70, %c0_71] : memref<1x3x8x128xf32, #tpu.memory_space<vmem>>, vector<1x1x8x128xf32>
    %115 = vector.shape_cast %114 : vector<1x1x8x128xf32> to vector<8x128xf32>
    %116 = vector.shape_cast %113 : vector<8x128xf32> to vector<1x1x8x128xf32>
    tpu.vector_store %arg5[%c0_68, %c2_69, %c0_70, %c0_71], %116 {strides = array<i32>} : memref<1x3x8x128xf32, #tpu.memory_space<vmem>>, vector<1x1x8x128xf32>,
    %cst_72 = arith.constant 3.000000e+00 : f32
    %117 = vector.broadcast %cst_72 : f32 to vector<8x128xf32>
    %118 = arith.mulf %117, %95 : vector<8x128xf32>
    %c0_73 = arith.constant 0 : index
    %c0_74 = arith.constant 0 : index
    %c0_75 = arith.constant 0 : index
    %c0_76 = arith.constant 0 : index
    %119 = vector.load %arg6[%c0_73, %c0_74, %c0_75, %c0_76] : memref<1x1x8x128xf32, #tpu.memory_space<vmem>>, vector<1x1x8x128xf32>
    %120 = vector.shape_cast %119 : vector<1x1x8x128xf32> to vector<8x128xf32>
    %121 = vector.shape_cast %118 : vector<8x128xf32> to vector<1x1x8x128xf32>
    tpu.vector_store %arg6[%c0_73, %c0_74, %c0_75, %c0_76], %121 {strides = array<i32>} : memref<1x1x8x128xf32, #tpu.memory_space<vmem>>, vector<1x1x8x128xf32>,
    return
  }
  func.func @transform_0(%arg0: i32, %arg1: i32) -> (i32, i32) {
    %c0_i32 = arith.constant 0 : i32
    %c0_i32_0 = arith.constant 0 : i32
    %c0_i32_1 = arith.constant 0 : i32
    return %c0_i32, %c0_i32_0 : i32, i32
  }
  func.func @transform_1(%arg0: i32, %arg1: i32) -> i32 {
    %c0_i32 = arith.constant 0 : i32
    %c0_i32_0 = arith.constant 0 : i32
    return %c0_i32 : i32
  }
  func.func @transform_2(%arg0: i32, %arg1: i32) -> (i32, i32, i32, i32) {
    %c0_i32 = arith.constant 0 : i32
    %c0_i32_0 = arith.constant 0 : i32
    %c0_i32_1 = arith.constant 0 : i32
    return %arg0, %c0_i32, %arg1, %c0_i32_0 : i32, i32, i32, i32
  }
  func.func @transform_3(%arg0: i32, %arg1: i32) -> (i32, i32, i32, i32) {
    %c0_i32 = arith.constant 0 : i32
    %c0_i32_0 = arith.constant 0 : i32
    %c0_i32_1 = arith.constant 0 : i32
    return %arg0, %c0_i32, %arg1, %c0_i32_0 : i32, i32, i32, i32
  }
  func.func @transform_4(%arg0: i32, %arg1: i32) -> (i32, i32, i32, i32) {
    %c0_i32 = arith.constant 0 : i32
    %c0_i32_0 = arith.constant 0 : i32
    %c0_i32_1 = arith.constant 0 : i32
    return %arg0, %c0_i32, %arg1, %c0_i32_0 : i32, i32, i32, i32
  }
  func.func @transform_5(%arg0: i32, %arg1: i32) -> (i32, i32, i32, i32) {
    %c0_i32 = arith.constant 0 : i32
    %c0_i32_0 = arith.constant 0 : i32
    %c0_i32_1 = arith.constant 0 : i32
    return %arg0, %c0_i32, %arg1, %c0_i32_0 : i32, i32, i32, i32
  }
}

</mosaic_0001>

<bundles_post_ra>
// kernel: tpu_custom_call.1
= control target key start
LH: loop header
LB: loop body
LE: loop exit
PB: predicated region body
PF: predicated region fallthrough
CT: control target
= control target key end

     0   :  { %s1381_s0 = inlined_call_operand.hbm [shape: f32[3,4], index: 0, kind: input, shape index: {}]   ;;  %s1382_s1 = inlined_call_operand.vmem [shape: f32[3], index: 1, kind: input, shape index: {}]   ;;  %s1383_s2 = inlined_call_operand.hbm [shape: f32[2,4,8,128], index: 2, kind: input, shape index: {}]   ;;  %s1384_s3 = inlined_call_operand.hbm [shape: f32[2,3,8,128], index: 3, kind: output, shape index: {0}]   ;;  %s1385_s4 = inlined_call_operand.hbm [shape: f32[2,1,8,128], index: 4, kind: output, shape index: {1}]   ;;  %s1386_s5 = inlined_call_operand.hbm [shape: f32[2,3,8,128], index: 5, kind: output, shape index: {2}]  }
   0x1   :  { %1391 = sst [smem:[#allocation18_spill]] %s1381_s0 }
   0x2   :  { %1392 = sst [smem:[#allocation19_spill]] %s1382_s1 }
   0x3   :  { %11 = vsyncpa [#allocation5], 0 }
   0x4   :  { %12 = vsyncpa [#allocation6], 0 }
   0x5   :  { %13 = vsyncpa [#allocation3], 0 }
   0x6   :  { %15 = vsyncpa [#allocation3 + $0x1], 0 }
   0x7   :  { %16 = vsyncpa [#allocation4], 0 }
   0x8   :  { %18 = vsyncpa [#allocation4 + $0x1], 0 }
   0x9   :  { %19 = vsyncpa [#allocation11], 0 }
   0xa   :  { %21 = vsyncpa [#allocation11 + $0x1], 0  ;;  %s1069_s18 = smov 0   ;;  %s1071_s19 = smov 0  }
   0xb   :  { %s1073_s20 = smov 0   ;;  %s1075_s21 = smov 0  }
   0xc   :  { %s1077_s22 = smov 0   ;;  %s1079_s23 = smov 0  }
   0xd LB: > { %s1100_s24 = sadd.s32 4294967295, %s1027_s23   ;;  %s1387_s25 = sadd.s32 4294967294, %s1027_s23   ;;  %s1027_s23 = sphi %s1079_s23, %s27_s23   ;;  %s1023_s22 = sphi %s1077_s22, %s1415_s22   ;;  %s1019_s21 = sphi %s1075_s21, %s1414_s21   ;;  %s1015_s20 = sphi %s1073_s20, %s1413_s20   ;;  %s1011_s19 = sphi %s1071_s19, %s1412_s19   ;;  %s1007_s18 = sphi %s1069_s18, %s1411_s18  }
   0xe   : > { %p97_p0 = scmp.ne.s32.totalorder %s1015_s20, %s1011_s19  ;;  %p98_p1 = scmp.eq.s32.totalorder %s1027_s23, 0 }
   0xf   : > { %p103_p2 = scmp.ne.s32.totalorder %s1011_s19, %s1007_s18  ;;  %p1388_p3 = scmp.eq.s32.totalorder %s1100_s24, 0 }
  0x10   : > { %p129_p4 = scmp.eq.s32.totalorder %s1100_s24, 1  ;;  %p99_p5 = por %p98_p1, %p97_p0 }
  0x11   : > { %p135_p6 = scmp.eq.s32.totalorder %s1387_s25, 1  ;;  %p1115_p7 = por %p1388_p3, %p103_p2 }
  0x12   : > { %p1119_p8 = por %p129_p4, %p97_p0  ;;  %p666_p10 = scmp.ge.s32.totalorder %s1027_s23, 1 }
  0x13   : > { %s1393_s27 = scalar_select %p1115_p7, 1, 0 }
  0x14   : > { %s1394_s28 = scalar_select %p1119_p8, 1, 0 }
  0x15   : > { %p1123_p9 = por %p135_p6, %p103_p2  ;;  %p198_p11 = scmp.lt.s32.totalorder %s1027_s23, 3 }
  0x16   : > { %p747_p1 = scmp.lt.s32.totalorder %s1027_s23, 2  ;;  %s1397_s1 = sld [smem:[#allocation19_spill]] }
  0x17   : > { %s1395_s29 = scalar_select %p1123_p9, 1, 0 }
  0x18   : > { %p1130_p13 = pnand %p666_p10, %p198_p11  ;;  %p1140_p4 = pnand %p747_p1, %p99_p5 }
  0x19   : > { %s231_s11 = sand.u32 1, %s1015_s20   ;;  %s39_s12 = sadd.s32 1, %s1023_s22 }
  0x1a   : > { %p724_p0 = pneg %p1130_p13  ;;  %s1400_s0 = sld [smem:[#allocation18_spill]] }
  0x1c   : > { %s220_s8 = sshll.u32 %s1397_s1, 4  ;;  %p1146_p2 = pnand %p724_p0, %p1388_p3  ;;  %s221_s8 = int_to_ptr.vmem [resolvable:$true] %s220_s8 }
  0x1e   : > { %p821_p6 = pneg %p1146_p2 }
  0x20   : > { %s819_s15 = scalar_lea.hbm %s1400_s0, 64 }
  0x21   : > { %p820_p5 = scmp.ne.s32.totalorder %s1400_s0, %s819_s15  ;;  %p826_p1 = scmp.lt.u32.totalorder %s819_s15, %s1400_s0 }
  0x23   : > { %p822_p10 = pnand %p821_p6, %p820_p5 }
  0x25   : > { %p823_p11 = pneg %p822_p10 }
  0x27   : > { %p828_p0 = pnand %p826_p1, %p823_p11 }
  0x29   : > { %831 = shalt.err (!%p828_p0)
}
  0x2a   : > { %s1029_s25 = smov [#allocation2]   ;;  %s832_s14 = scalar_lea.vmem %s221_s8, 16 }
  0x2b   : > { %727 = dma.hbm_to_smem (!%p1146_p2), %s1400_s0, 64, %s1029_s25, [#allocation5]  }
  0x2c   : > { %p833_p12 = scmp.ne.s32.totalorder %s221_s8, %s832_s14  ;;  %p840_p8 = scmp.lt.s32.totalorder %s221_s8, %s221_s8 }
  0x2d   : > { %p841_p5 = scmp.lt.s32.totalorder %s832_s14, %s832_s14 }
  0x2e   : > { %p835_p3 = pnand %p833_p12, %p821_p6 }
  0x2f   : > { %p842_p10 = por %p841_p5, %p840_p8 }
  0x30   : > { %p836_p9 = pneg %p835_p3 }
  0x32   : > { %p843_p7 = pnand %p842_p10, %p836_p9 }
  0x34   : > { %846 = shalt.err (!%p843_p7)
}
  0x35   : > { %s1030_s16 = smov [#allocation7]   ;;  %p41_p11 = scmp.ge.s32.totalorder %s39_s12, 2 }
  0x36   : > { %730 = dma.vmem_to_smem (!%p1146_p2), %s221_s8, 16, %s1030_s16, [#allocation6]  }
  0x37   : > { %s670_s25 = sshll.u32 %s231_s11, 5  ;;  %s704_s26 = sshll.u32 %s1023_s22, 9 }
  0x38   : > { %s1417_s12 = smov (%p41_p11, %s39_s12), 0  ;;  %s1178_s10 = scalar_lea.hbm %s1383_s2, %s704_s26 }
  0x39   : > { %s85_s6 = ssub.s32 %s1023_s22, %s1417_s12  ;;  %s235_s7 = scalar_lea.vmem [#allocation8], %s670_s25 }
  0x3a   : > { %s243_s8 = sshll.u32 %s235_s7, 4  ;;  %p88_p3 = scmp.eq.s32.totalorder %s85_s6, 0  ;;  %s1182_s8 = int_to_ptr.vmem [resolvable:$true] %s243_s8 }
  0x3b   : > { %s1401_s13 = sadd.s32 1, %s1015_s20  ;;  %s1191_s16 = scalar_lea.sflag [#allocation3], %s231_s11 }
  0x3c   : > { %s1187_s14 = scalar_select %p88_p3, %s1015_s20, %s1401_s13  }
  0x3d   : > { %s847_s15 = scalar_lea.hbm %s1178_s10, 512  ;;  %p849_p8 = pneg %p1140_p4 }
  0x3e   : > { %p848_p7 = scmp.ne.s32.totalorder %s1178_s10, %s847_s15  ;;  %s852_s17 = scalar_lea.hbm %s1383_s2, 1024 }
  0x3f   : > { %p853_p2 = scmp.lt.u32.totalorder %s1178_s10, %s1383_s2  ;;  %p854_p6 = scmp.lt.u32.totalorder %s852_s17, %s847_s15 }
  0x40   : > { %p850_p9 = pnand %p849_p8, %p848_p7  ;;  %p856_p0 = scmp.lt.u32.totalorder %s847_s15, %s1178_s10 }
  0x41   : > { %p855_p1 = por %p854_p6, %p853_p2 }
  0x42   : > { %p851_p12 = pneg %p850_p9 }
  0x43   : > { %p857_p5 = por %p856_p0, %p855_p1 }
  0x45   : > { %p858_p10 = pnand %p857_p5, %p851_p12 }
  0x47   : > { %861 = shalt.err (!%p858_p10)
}
  0x48   : > { %s862_s11 = scalar_lea.vmem %s1182_s8, 512  ;;  %s1031_s13 = smov [#allocation8]  }
  0x49   : > { %p863_p11 = scmp.ne.s32.totalorder %s1182_s8, %s862_s11  ;;  %s867_s26 = sshll.u32 %s1031_s13, 4  ;;  %s868_s26 = int_to_ptr.vmem [resolvable:$false] %s867_s26 }
  0x4a   : > { %s869_s25 = scalar_lea.vmem %s868_s26, 1024  ;;  %p870_p9 = scmp.lt.s32.totalorder %s1182_s8, %s868_s26 }
  0x4b   : > { %p865_p3 = pnand %p863_p11, %p849_p8  ;;  %p871_p2 = scmp.lt.s32.totalorder %s869_s25, %s862_s11 }
  0x4d   : > { %p866_p7 = pneg %p865_p3  ;;  %p872_p6 = por %p871_p2, %p870_p9 }
  0x4f   : > { %p873_p1 = pnand %p872_p6, %p866_p7 }
  0x51   : > { %876 = shalt.err (!%p873_p1)
}
  0x52   : > { %s1032_s15 = smov 128   ;;  %s1033_s17 = smov 8  }
  0x53   : > { %734 = dma.hbm_to_vmem [thread:$0]  (!%p1140_p4), %s1178_s10, 512, %s1182_s8, %s1191_s16, %s1032_s15, %s1032_s15, %s1033_s17  }
  0x54   : > { %255 = sbr.rel (%p1130_p13) target bundleno = 241 (0xf1), region = 32  ;;  %p1402_p8 = scmp.eq.s32.totalorder (!%p1130_p13), %s1100_s24, 0 }
  0x5b   : > { %986 = dma.done.wait (%p1402_p8), [#allocation5], 64   ;;  %p1403_p12 = pmov %p1402_p8 }
  0x5c   : > { %p1404_p0 = pmov %p1402_p8 }
  0x5d   : > { %988 = vsyncadd (%p1403_p12), [#allocation5], 4294967232 }
  0x5e   : > { %990 = dma.done.wait (%p1404_p0), [#allocation6], 16   ;;  %p1405_p5 = pmov %p1404_p0 }
  0x5f   : > { %s1230_s6 = sand.u32 1, %s1011_s19   ;;  %p1406_p13 = scmp.ne.s32.totalorder %s1393_s27, 0 }
  0x60   : > { %992 = vsyncadd (%p1405_p5), [#allocation6], 4294967280  ;;  %s676_s30 = sshll.u32 %s1230_s6, 5  ;;  %s266_s9 = scalar_lea.sflag [#allocation3], %s1230_s6 }
  0x61   : > { %s269_s10 = scalar_lea.vmem [#allocation8], %s676_s30 }
  0x62   : > { %994 = dma.done.wait (%p1406_p13), %s266_s9, 512  }
  0x63   : > { %996 = vsyncadd (%p1406_p13), %s266_s9, 4294966784 }
  0x64   : > { %274 = sfence }
  0x65   : > { %s314_s8 = sld [smem:[#allocation2]]  ;;  %s681_s16 = sld [smem:[#allocation2 + $0x1]]  ;;  %v307_v0 = vld [vmem:[%s269_s10] sm:$0xff]  ;;  %v678_v1 = vld [vmem:[%s269_s10 + $0x8] sm:$0xff]  ;;  %v679_v2 = vld [vmem:[%s269_s10 + $0x10] sm:$0xff] }
  0x66   : > { %s682_s7 = sld [smem:[#allocation2 + $0x2]]  ;;  %s683_s11 = sld [smem:[#allocation2 + $0x3]]  ;;  %v680_v3 = vld [vmem:[%s269_s10 + $0x18] sm:$0xff] }
  0x67   : > { %s1238_s13 = sld [smem:[#allocation7]]  ;;  %s685_s25 = sld [smem:[#allocation2 + $0x81]] }
  0x68   : > { %s684_s26 = sld [smem:[#allocation2 + $0x80]]  ;;  %s686_s15 = sld [smem:[#allocation2 + $0x82]] }
  0x69   : > { %s687_s17 = sld [smem:[#allocation2 + $0x83]]  ;;  %s689_s30 = sld [smem:[#allocation2 + $0x100]] }
  0x6a   : > { %s690_s0 = sld [smem:[#allocation2 + $0x101]]  ;;  %s691_s27 = sld [smem:[#allocation2 + $0x102]] }
  0x6b   : > { %v315_v4 = vstv %s314_s8  ;;  %v318_v6 = vstv %s681_s16  ;;  %s692_s9 = sld [smem:[#allocation2 + $0x103]]  ;;  %s1240_s1 = sld [smem:[#allocation7 + $0x1]] }
  0x6c   : > { %v316_v5 = vmul.f32 %v315_v4, %v307_v0  ;;  %v319_v7 = vmul.f32 %v678_v1, %v318_v6  ;;  %v322_v8 = vstv %s682_s7  ;;  %v326_v9 = vstv %s683_s11  ;;  %s693_s10 = sld [smem:[#allocation7 + $0x2]]  ;;  %s677_s8 = sshll.u32 %s1230_s6, 3 }
  0x6d   : > { %v323_v10 = vmul.f32 %v679_v2, %v322_v8  ;;  %v327_v11 = vmul.f32 %v680_v3, %v326_v9  ;;  %v352_v15 = vstv %s685_s25  ;;  %v330_v17 = vstv %s1238_s13  ;;  %s299_s16 = scalar_lea.vmem [#allocation10], %s677_s8  ;;  %s700_s25 = sshll.u32 %s1019_s21, 7 }
  0x6e   : > { %v349_v12 = vstv %s684_s26  ;;  %v320_v13 = vadd.f32 %v319_v7, %v316_v5  ;;  %v356_v16 = vstv %s686_s15  ;;  %v353_v18 = vmul.f32 %v678_v1, %v352_v15  ;;  %s477_s7 = sshll.u32 %s299_s16, 4  ;;  %s440_s26 = sand.u32 1, %s1100_s24   ;;  %s1257_s7 = int_to_ptr.vmem [resolvable:$true] %s477_s7 }
  0x6f   : > { %v350_v14 = vmul.f32 %v349_v12, %v307_v0  ;;  %v357_v19 = vmul.f32 %v679_v2, %v356_v16  ;;  %v360_v20 = vstv %s687_s17  ;;  %v384_v23 = vstv %s689_s30  ;;  %s706_s15 = smul.u32 384, %s1019_s21  ;;  %s877_s30 = scalar_lea.vmem %s1257_s7, 128 }
  0x70   : > { %v324_v21 = vadd.f32 %v323_v10, %v320_v13  ;;  %v361_v22 = vmul.f32 %v680_v3, %v360_v20  ;;  %v387_v24 = vstv %s690_s0  ;;  %v385_v26 = vmul.f32 %v384_v23, %v307_v0  ;;  %s705_s0 = smul.u32 24, %s1230_s6  ;;  %p878_p4 = scmp.ne.s32.totalorder %s1257_s7, %s877_s30 }
  0x71   : > { %v354_v25 = vadd.f32 %v353_v18, %v350_v14  ;;  %v388_v27 = vmul.f32 %v678_v1, %v387_v24  ;;  %v391_v28 = vstv %s691_s27  ;;  %v395_v31 = vstv %s692_s9  ;;  %s1266_s9 = scalar_lea.hbm %s1385_s4, %s700_s25  ;;  %s1271_s21 = scalar_lea.hbm %s1384_s3, %s706_s15 }
  0x72   : > { %v328_v29 = vadd.f32 %v327_v11, %v324_v21  ;;  %v392_v30 = vmul.f32 %v679_v2, %v391_v28  ;;  %v396_v34 = vmul.f32 %v680_v3, %v395_v31  ;;  %v364_v36 = vstv %s1240_s1  ;;  %s1247_s1 = scalar_lea.vmem [#allocation12], %s705_s0  ;;  %s292_s11 = scalar_lea.vmem [#allocation9], %s705_s0 }
  0x73   : > { %v358_v32 = vadd.f32 %v357_v19, %v354_v25  ;;  %v389_v33 = vadd.f32 %v388_v27, %v385_v26  ;;  %v399_v40 = vstv %s693_s10  ;;  %s460_s13 = sshll.u32 %s292_s11, 4  ;;  %s491_s17 = sshll.u32 %s1247_s1, 4  ;;  %s1261_s13 = int_to_ptr.vmem [resolvable:$true] %s460_s13  ;;  %s1273_s17 = int_to_ptr.vmem [resolvable:$true] %s491_s17 }
  0x74   : > { %v331_v35 = vadd.f32 %v330_v17, %v328_v29  ;;  %s1278_s8 = scalar_lea.hbm %s1386_s5, %s706_s15  ;;  %s1280_s25 = scalar_lea.sflag [#allocation11], %s440_s26 }
  0x75   : > { %v362_v37 = vadd.f32 %v361_v22, %v358_v32  ;;  %v393_v38 = vadd.f32 %v392_v30, %v389_v33  ;;  %p1407_p10 = scmp.ne.s32.totalorder %s1394_s28, 0  ;;  %s1034_s27 = smov [#allocation10]  }
  0x76   : > { %v333_v39 = vand.u32 2147483647, %v331_v35  ;;  %v332_v3 = vmax.f32 %v331_v35, 0.0  ;;  %s881_s24 = sshll.u32 %s1034_s27, 4  ;;  %s882_s24 = int_to_ptr.vmem [resolvable:$false] %s881_s24 }
  0x77   : > { %v365_v41 = vadd.f32 %v364_v36, %v362_v37  ;;  %v397_v42 = vadd.f32 %v396_v34, %v393_v38  ;;  %p879_p11 = pnand %p878_p4, %p1407_p10  ;;  %p884_p7 = scmp.lt.s32.totalorder %s1257_s7, %s882_s24 }
  0x78   : > { %v334_v43 = vsub.f32 0.0, %v333_v39 }
  0x79   : > { %v367_v44 = vand.u32 2147483647, %v365_v41  ;;  %v400_v45 = vadd.f32 %v399_v40, %v397_v42  ;;  %v366_v10 = vmax.f32 %v365_v41, 0.0  ;;  %p880_p3 = pneg %p879_p11 }
  0x7a   : > { %v335_v46 = vmul.f32 1.442695, %v334_v43 }
  0x7b   : > { %v368_v47 = vsub.f32 0.0, %v367_v44  ;;  %v402_v48 = vand.u32 2147483647, %v400_v45  ;;  %v401_v15 = vmax.f32 %v400_v45, 0.0 }
  0x7c   : > { %805 = vpow2.f32 %v335_v46 }
  0x7d   : > { %v369_v49 = vmul.f32 1.442695, %v368_v47  ;;  %v403_v50 = vsub.f32 0.0, %v402_v48 }
  0x7f   : > { %807 = vpow2.f32 %v369_v49  ;;  %v404_v51 = vmul.f32 1.442695, %v403_v50 }
  0x81   : > { %809 = vpow2.f32 %v404_v51 }
  0x86   : > { %v806_v52 = vpop.eup %805 }
  0x87   : > { %v337_v53 = vadd.f32 1.0, %v806_v52  ;;  %v340_v55 = vmul.f32 -0.5, %v806_v52  ;;  %v343_v61 = vand.u32 2147483647, %v806_v52 }
  0x89   : > { %v808_v54 = vpop.eup %807  ;;  %811 = vlog2.f32 %v337_v53  ;;  %v341_v60 = vadd.f32 1.0, %v340_v55  ;;  %vm344_vm0 = vcmp.lt.f32.partialorder %v343_v61, 0.0004427343 }
  0x8a   : > { %v371_v56 = vadd.f32 1.0, %v808_v54  ;;  %v374_v59 = vmul.f32 -0.5, %v808_v54  ;;  %v377_v1 = vand.u32 2147483647, %v808_v54 }
  0x8b   : > { %v810_v57 = vpop.eup %809  ;;  %v342_v0 = vmul.f32 %v806_v52, %v341_v60 }
  0x8c   : > { %813 = vlog2.f32 %v371_v56  ;;  %v406_v58 = vadd.f32 1.0, %v810_v57  ;;  %v409_v62 = vmul.f32 -0.5, %v810_v57  ;;  %v375_v63 = vadd.f32 1.0, %v374_v59 }
  0x8d   : > { %v412_v6 = vand.u32 2147483647, %v810_v57  ;;  %vm378_vm1 = vcmp.lt.f32.partialorder %v377_v1, 0.0004427343 }
  0x8e   : > { %815 = vlog2.f32 %v406_v58  ;;  %v410_v4 = vadd.f32 1.0, %v409_v62  ;;  %v376_v7 = vmul.f32 %v808_v54, %v375_v63 }
  0x8f   : > { %vm413_vm2 = vcmp.lt.f32.partialorder %v412_v6, 0.0004427343 }
  0x90   : > { %v411_v13 = vmul.f32 %v810_v57, %v410_v4 }
  0x93   : > { %v812_v2 = vpop.eup %811 }
  0x94   : > { %v339_v5 = vmul.f32 0.6931472, %v812_v2 }
  0x96   : > { %v814_v8 = vpop.eup %813  ;;  %v345_v9 = vsel %vm344_vm0, %v342_v0, %v339_v5 }
  0x97   : > { %v346_v11 = vadd.f32 %v345_v9, %v332_v3  ;;  %v373_v12 = vmul.f32 0.6931472, %v814_v8 }
  0x98   : > { %v816_v14 = vpop.eup %815 }
  0x99   : > { %v347_v16 = vadd.f32 1.0, %v346_v11  ;;  %v379_v17 = vsel %vm378_vm1, %v376_v7, %v373_v12  ;;  %v408_v18 = vmul.f32 0.6931472, %v816_v14 }
  0x9a   : > { %v380_v19 = vadd.f32 %v379_v17, %v366_v10 }
  0x9b   : > { %v414_v20 = vsel %vm413_vm2, %v411_v13, %v408_v18  ;;  %420 = vst [vmem:[%s1247_s1] sm:$0xff] %v347_v16 }
  0x9c   : > { %v381_v21 = vadd.f32 1.0, %v380_v19  ;;  %v415_v22 = vadd.f32 %v414_v20, %v401_v15 }
  0x9e   : > { %v382_v23 = vadd.f32 %v381_v21, %v347_v16  ;;  %v416_v24 = vadd.f32 1.0, %v415_v22  ;;  %694 = vst [vmem:[%s1247_s1 + $0x8] sm:$0xff] %v381_v21 }
  0xa0   : > { %v417_v25 = vadd.f32 %v416_v24, %v382_v23  ;;  %696 = vst [vmem:[%s1247_s1 + $0x10] sm:$0xff] %v416_v24 }
  0xa2   : > { %817 = vrcp.f32 %v417_v25 }
  0xac   : > { %v818_v26 = vpop.eup %817 }
  0xad   : > { %v433_v27 = vmul.f32 3.0, %v818_v26  ;;  %v421_v28 = vmul.f32 %v818_v26, %v347_v16  ;;  %v425_v29 = vmul.f32 %v818_v26, %v381_v21  ;;  %v430_v30 = vmul.f32 %v818_v26, %v416_v24 }
  0xaf   : > { %434 = vst [vmem:[%s299_s16] sm:$0xff] %v433_v27  ;;  %422 = vst [vmem:[%s292_s11] sm:$0xff] %v421_v28  ;;  %s883_s16 = scalar_lea.vmem %s882_s24, 256 }
  0xb0   : > { %695 = vst [vmem:[%s292_s11 + $0x8] sm:$0xff] %v425_v29  ;;  %697 = vst [vmem:[%s292_s11 + $0x10] sm:$0xff] %v430_v30  ;;  %p885_p9 = scmp.lt.s32.totalorder %s883_s16, %s877_s30 }
  0xb2   : > { %p886_p2 = por %p885_p9, %p884_p7 }
  0xb4   : > { %p887_p6 = pnand %p886_p2, %p880_p3 }
  0xb6   : > { %890 = shalt.err (!%p887_p6)
}
  0xb7   : > { %s891_s11 = scalar_lea.hbm %s1266_s9, 128  ;;  %s895_s10 = scalar_lea.hbm %s1385_s4, 256 }
  0xb8   : > { %p892_p1 = scmp.ne.s32.totalorder %s1266_s9, %s891_s11  ;;  %p896_p0 = scmp.lt.u32.totalorder %s1266_s9, %s1385_s4 }
  0xb9   : > { %p897_p5 = scmp.lt.u32.totalorder %s895_s10, %s891_s11  ;;  %p899_p4 = scmp.lt.u32.totalorder %s891_s11, %s1266_s9 }
  0xba   : > { %p893_p8 = pnand %p892_p1, %p1407_p10 }
  0xbb   : > { %p898_p13 = por %p897_p5, %p896_p0 }
  0xbc   : > { %p894_p12 = pneg %p893_p8 }
  0xbd   : > { %p900_p11 = por %p899_p4, %p898_p13 }
  0xbf   : > { %p901_p3 = pnand %p900_p11, %p894_p12 }
  0xc1   : > { %904 = shalt.err (!%p901_p3)
}
  0xc2   : > { %719 = dma.vmem_to_hbm [thread:$0]  (%p1407_p10), %s1257_s7, 128, %s1266_s9, %s1280_s25  }
  0xc3   : > { %s436_s30 = scalar_lea.sflag [#allocation4], %s1230_s6  ;;  %s905_s27 = scalar_lea.vmem %s1261_s13, 384 }
  0xc4   : > { %p906_p7 = scmp.ne.s32.totalorder %s1261_s13, %s905_s27  ;;  %s1035_s24 = smov [#allocation9]  }
  0xc5   : > { %s909_s16 = sshll.u32 %s1035_s24, 4  ;;  %s910_s16 = int_to_ptr.vmem [resolvable:$false] %s909_s16 }
  0xc6   : > { %p907_p9 = pnand %p906_p7, %p1407_p10  ;;  %s911_s11 = scalar_lea.vmem %s910_s16, 768 }
  0xc7   : > { %p912_p6 = scmp.lt.s32.totalorder %s1261_s13, %s910_s16  ;;  %p913_p1 = scmp.lt.s32.totalorder %s911_s11, %s905_s27 }
  0xc8   : > { %p908_p2 = pneg %p907_p9 }
  0xc9   : > { %p914_p8 = por %p913_p1, %p912_p6 }
  0xcb   : > { %p915_p12 = pnand %p914_p8, %p908_p2 }
  0xcd   : > { %918 = shalt.err (!%p915_p12)
}
  0xce   : > { %s919_s7 = scalar_lea.hbm %s1271_s21, 384  ;;  %s923_s15 = scalar_lea.hbm %s1384_s3, 768 }
  0xcf   : > { %p920_p0 = scmp.ne.s32.totalorder %s1271_s21, %s919_s7  ;;  %p924_p4 = scmp.lt.u32.totalorder %s1271_s21, %s1384_s3 }
  0xd0   : > { %p925_p11 = scmp.lt.u32.totalorder %s923_s15, %s919_s7  ;;  %p927_p7 = scmp.lt.u32.totalorder %s919_s7, %s1271_s21 }
  0xd1   : > { %p921_p5 = pnand %p920_p0, %p1407_p10 }
  0xd2   : > { %p926_p3 = por %p925_p11, %p924_p4 }
  0xd3   : > { %p922_p13 = pneg %p921_p5 }
  0xd4   : > { %p928_p9 = por %p927_p7, %p926_p3 }
  0xd6   : > { %p929_p2 = pnand %p928_p9, %p922_p13 }
  0xd8   : > { %932 = shalt.err (!%p929_p2)
}
  0xd9   : > { %s1036_s1 = smov 128   ;;  %s1037_s27 = smov 8  }
  0xda   : > { %718 = dma.vmem_to_hbm [thread:$0]  (%p1407_p10), %s1261_s13, 384, %s1271_s21, %s436_s30, %s1036_s1, %s1036_s1, %s1037_s27  }
  0xdb   : > { %s933_s24 = scalar_lea.vmem %s1273_s17, 384  ;;  %s1038_s16 = smov [#allocation12]  }
  0xdc   : > { %p934_p6 = scmp.ne.s32.totalorder %s1273_s17, %s933_s24  ;;  %s937_s11 = sshll.u32 %s1038_s16, 4  ;;  %s938_s11 = int_to_ptr.vmem [resolvable:$false] %s937_s11 }
  0xdd   : > { %s939_s7 = scalar_lea.vmem %s938_s11, 768  ;;  %p940_p12 = scmp.lt.s32.totalorder %s1273_s17, %s938_s11 }
  0xde   : > { %p935_p1 = pnand %p934_p6, %p1407_p10  ;;  %p941_p0 = scmp.lt.s32.totalorder %s939_s7, %s933_s24 }
  0xe0   : > { %p936_p8 = pneg %p935_p1  ;;  %p942_p5 = por %p941_p0, %p940_p12 }
  0xe2   : > { %p943_p13 = pnand %p942_p5, %p936_p8 }
  0xe4   : > { %946 = shalt.err (!%p943_p13)
}
  0xe5   : > { %s947_s6 = scalar_lea.hbm %s1278_s8, 384  ;;  %s951_s30 = scalar_lea.hbm %s1386_s5, 768 }
  0xe6   : > { %p948_p4 = scmp.ne.s32.totalorder %s1278_s8, %s947_s6  ;;  %p952_p7 = scmp.lt.u32.totalorder %s1278_s8, %s1386_s5 }
  0xe7   : > { %p953_p9 = scmp.lt.u32.totalorder %s951_s30, %s947_s6  ;;  %p955_p6 = scmp.lt.u32.totalorder %s947_s6, %s1278_s8 }
  0xe8   : > { %p949_p11 = pnand %p948_p4, %p1407_p10 }
  0xe9   : > { %p954_p2 = por %p953_p9, %p952_p7 }
  0xea   : > { %p950_p3 = pneg %p949_p11 }
  0xeb   : > { %p956_p1 = por %p955_p6, %p954_p2 }
  0xed   : > { %p957_p8 = pnand %p956_p1, %p950_p3 }
  0xef   : > { %960 = shalt.err (!%p957_p8)
}
  0xf0   : > { %720 = dma.vmem_to_hbm [thread:$0]  (%p1407_p10), %s1273_s17, 384, %s1278_s8, %s1280_s25, %s1036_s1, %s1036_s1, %s1037_s27  }
  0xf1 PF: > { %s506_s15 = sand.u32 1, %s1007_s18   ;;  %p1408_p12 = scmp.ne.s32.totalorder %s1395_s29, 0 }
  0xf2   : > { %p1409_p0 = scmp.ge.s32.totalorder %s1027_s23, 2  ;;  %s507_s10 = scalar_lea.sflag [#allocation4], %s506_s15 }
  0xf4   : > { %p736_p5 = pnand %p1409_p0, %p1408_p12 }
  0xf6   : > { %998 = dma.done.wait (!%p736_p5), %s507_s10, 384  }
  0xf7   : > { %1000 = vsyncadd (!%p736_p5), %s507_s10, 4294966912  ;;  %s1410_s28 = sadd.s32 4294967294, %s1027_s23  }
  0xf8   : > { %s515_s0 = sand.u32 1, %s1410_s28  }
  0xf9   : > { %s516_s24 = scalar_lea.sflag [#allocation11], %s515_s0 }
  0xfa   : > { %1002 = dma.done.wait (!%p736_p5), %s516_s24, 512  }
  0xfb   : > { %1004 = vsyncadd (!%p736_p5), %s516_s24, 4294966784  ;;  %s27_s23 = sadd.s32 1, %s1027_s23   ;;  %s1411_s18 = smov %s1011_s19 }
  0xfc   : > { %p24_p10 = scmp.ge.s32.totalorder %s27_s23, 4   ;;  %s1412_s19 = smov %s1015_s20 }
  0xfd   : > { %s1413_s20 = smov %s1187_s14  ;;  %s1414_s21 = smov %s1023_s22 }
  0xfe   : > { %s1415_s22 = smov %s1417_s12  ;;  %26 = sbr.rel (!%p24_p10) target bundleno = 13 (0xd), region = 126 }
 0x105   :  { %530 = vsyncpa [#allocation3], 1 }
 0x106   :  { %532 = vsyncpa [#allocation3 + $0x1], 1 }
 0x107   :  { %533 = vsyncpa [#allocation4], 1 }
 0x108   :  { %535 = vsyncpa [#allocation4 + $0x1], 1 }
 0x109   :  { %536 = vsyncpa [#allocation11], 1 }
 0x10a   :  { %538 = vsyncpa [#allocation11 + $0x1], 1 }
 0x10b   :  { %539 = vsyncpa [#allocation5], 1 }
 0x10c   :  { %541 = vsyncpa [#allocation5 + $0x1], 1 }
 0x10d   :  { %542 = vsyncpa [#allocation6], 1 }
 0x10e   :  { %544 = vsyncpa [#allocation6 + $0x1], 1 }

</bundles_post_ra>
